<compile_context>
chip_gen: v5e
topology: v5e:2x2
jax: 0.10.0
libtpu: 0.0.40
codegen_flags: <defaults>
</compile_context>

<pallas_src>
import functools

import jax
import jax.numpy as jnp
from jax.experimental import pallas as pl
from jax.experimental.pallas import tpu as pltpu


def _cdiv(a, b):
    return -(-a // b)


def _round_up(a, m):
    return _cdiv(a, m) * m


def _dkd_kernel(s_ref, t_ref, lbl_ref, col_ref, out_ref, *,
                inv_temp, alpha, beta, n_rows):
    f32 = jnp.float32
    tn = s_ref.shape[0]

    s = s_ref[...].astype(f32) * inv_temp            # student logits / T
    t = t_ref[...].astype(f32) * inv_temp            # teacher logits / T

    # Ground-truth one-hot mask.  Column ids are a resident (1, C) input so no
    # per-step iota materialization; the compare broadcasts to (tn, C).
    gtb = col_ref[...] == lbl_ref[...]

    # One softmax pass per tensor (shared by TCKD and NCKD).
    ms = jnp.max(s, axis=1, keepdims=True)
    mt = jnp.max(t, axis=1, keepdims=True)
    es = jnp.exp(s - ms)                             # EUP pass 1
    et = jnp.exp(t - mt)                             # EUP pass 2
    ses = jnp.sum(es, axis=1, keepdims=True)
    set_ = jnp.sum(et, axis=1, keepdims=True)

    # Logit value at the ground-truth class, per row.
    s_lbl = jnp.sum(jnp.where(gtb, s, 0.0), axis=1, keepdims=True)
    t_lbl = jnp.sum(jnp.where(gtb, t, 0.0), axis=1, keepdims=True)
    es_gt = jnp.exp(s_lbl - ms)                      # per-row scalars
    et_gt = jnp.exp(t_lbl - mt)

    # ---- TCKD, first cat-mask column (the all-False `other` column is
    #      reproduced analytically in the wrapper) --------------------------
    log_ses = jnp.log(ses)
    log_set = jnp.log(set_)
    pt1 = et_gt / set_                                          # P_teacher@gt
    tckd_row = pt1 * ((t_lbl - mt - log_set) - (s_lbl - ms - log_ses))

    # ---- NCKD: softmax over non-gt classes, per-row algebra ---------------
    # Non-gt exp sums come from the per-row gt exponentials (no extra
    # full-tile selects).  NOTE: if the gt class dominates so strongly that
    # all non-gt exponentials underflow, the 1e-30 clamp keeps this finite
    # where the PyTorch reference would hit 0/0.
    ses_ng = jnp.maximum(ses - es_gt, 1e-30)
    set_ng = jnp.maximum(set_ - et_gt, 1e-30)
    d = t - s
    s_td = jnp.sum(et * d, axis=1, keepdims=True)               # full-tile mul+sum
    row_c = (mt - ms) + (jnp.log(set_ng) - jnp.log(ses_ng))     # per-row
    nckd_row = (s_td - et_gt * (t_lbl - s_lbl)) / set_ng - row_c

    contrib = alpha * tckd_row + beta * nckd_row                # (tn, 1)

    # Mask rows past the logical end of the batch (ragged last block reads
    # unspecified VMEM contents; everything above is row-local so masking the
    # per-row contribution is sufficient).
    row0 = pl.program_id(0) * tn
    rid = row0 + jax.lax.broadcasted_iota(jnp.int32, (tn, 1), 0)
    contrib = jnp.where(rid < n_rows, contrib, 0.0)

    out_ref[...] = jnp.full(out_ref.shape, jnp.sum(contrib), dtype=jnp.float32)


def _pick_tile_n(n, c, in_bytes):
    """Row-tile size + scoped-VMEM budget, sized from the local chip."""
    try:
        cap = int(getattr(pltpu.get_tpu_info(), "vmem_capacity_bytes", 64 << 20))
    except Exception:
        cap = 64 << 20                                   # conservative fallback
    if cap >= (128 << 20):                               # v5e / v6e
        vmem_limit = 100 << 20                           # ~28 MiB headroom
    else:                                                # v7x (64 MiB physical)
        vmem_limit = min(44 << 20, max(cap - (16 << 20), 16 << 20))

    # Sub-32-bit inputs pack along sublanes: keep the row tile a multiple of
    # the packing factor so input layouts stay unmasked.
    sub = 8 if in_bytes >= 4 else (16 if in_bytes == 2 else 32)

    # Live set per row: 2 logits inputs x 2 pipeline buffers (native dtype)
    # plus ~6 f32 full-width temporaries (s, t, es, et, gtb, one product).
    per_row = 4 * c * in_bytes + 6 * c * 4
    budget = int(vmem_limit * 0.8)
    if per_row * sub > budget:
        # TODO(synk): add a second "arbitrary" class-axis grid dimension with
        # online (running max / running sum) accumulators for very large
        # vocabularies instead of erroring out here.
        raise ValueError(
            f"DKDLoss Pallas kernel: class count {c} too large for a "
            f"full-width class block within {vmem_limit >> 20} MiB of VMEM")

    tile = max(sub, min(2048, (budget // per_row) // sub * sub))

    # Don't collapse the grid: prefer >= 8 steps (keeps both v7x TensorCores
    # and the DMA pipeline busy) while tiles stay >= 128 rows, else >= 2 steps.
    n_up = _round_up(n, sub)
    t8 = _round_up(_cdiv(n, 8), sub)
    if t8 >= 128:
        tile = min(tile, t8)
    elif n_up > 2 * sub:
        tile = min(tile, _round_up(_cdiv(n, 2), sub))
    tile = min(tile, n_up)
    return max(sub, tile), vmem_limit


def dkd_loss(student_logits, teacher_logits, labels, temp=4.0, alpha=1.0,
             beta=6.0, match_reference_nan=True):
    n, c = student_logits.shape
    in_bytes = max(jnp.dtype(student_logits.dtype).itemsize,
                   jnp.dtype(teacher_logits.dtype).itemsize)
    tile_n, vmem_limit = _pick_tile_n(n, c, in_bytes)
    num_blocks = _cdiv(n, tile_n)

    # No padding and no dtype upcast: logits are DMA'd as-is (ragged class /
    # row tails are handled by Mosaic lane masking + in-kernel row masking).
    lbl = labels.reshape(n, 1).astype(jnp.int32)
    col_ids = jax.lax.broadcasted_iota(jnp.int32, (1, c), 1)

    kernel = functools.partial(_dkd_kernel, inv_temp=float(1.0 / temp),
                               alpha=float(alpha), beta=float(beta), n_rows=n)

    partials = pl.pallas_call(
        kernel,
        out_shape=jax.ShapeDtypeStruct((num_blocks, 8, 128), jnp.float32),
        grid=(num_blocks,),
        in_specs=[
            pl.BlockSpec((tile_n, c), lambda i: (i, 0)),   # student tile
            pl.BlockSpec((tile_n, c), lambda i: (i, 0)),   # teacher tile
            pl.BlockSpec((tile_n, 1), lambda i: (i, 0)),   # labels tile
            pl.BlockSpec((1, c), lambda i: (0, 0)),        # resident column ids
        ],
        out_specs=pl.BlockSpec((1, 8, 128), lambda i: (i, 0, 0)),
        compiler_params=pltpu.CompilerParams(
            dimension_semantics=("parallel",),
            vmem_limit_bytes=vmem_limit),
    )(student_logits, teacher_logits, lbl, col_ids)

    scale = (temp * temp) / float(n)
    loss = jnp.sum(partials[:, 0, 0]) * jnp.float32(scale)

    if match_reference_nan:
        # Reference's all-False `other_mask`: the second cat-mask column is
        # target = 0 against log(0), which torch's kl_div sums as NaN.
        loss = loss + jnp.float32(jnp.nan)
    return loss


def _dkd_reference_finite(student_logits, teacher_logits, labels, temp, alpha, beta):
    """Pure-JAX mirror of the PyTorch module minus the NaN column."""
    xlogy = jax.scipy.special.xlogy
    s = student_logits.astype(jnp.float32) / temp
    t = teacher_logits.astype(jnp.float32) / temp
    n, c = s.shape
    gt = jax.nn.one_hot(labels, c, dtype=jnp.float32)
    ps1 = jnp.sum(jax.nn.softmax(s, axis=1) * gt, axis=1)
    pt1 = jnp.sum(jax.nn.softmax(t, axis=1) * gt, axis=1)
    tckd = jnp.sum(xlogy(pt1, pt1) - pt1 * jnp.log(ps1)) * temp ** 2 / n
    ps2 = jax.nn.log_softmax(s - 1000.0 * gt, axis=1)
    pt2 = jax.nn.softmax(t - 1000.0 * gt, axis=1)
    nckd = jnp.sum(xlogy(pt2, pt2) - pt2 * ps2) * temp ** 2 / n
    return alpha * tckd + beta * nckd


if __name__ == "__main__":
    key = jax.random.PRNGKey(0)
    k1, k2, k3 = jax.random.split(key, 3)

    # (37, 100): ragged rows AND classes -> exercises in-kernel row masking
    # and the full-extent (unpadded) class block.  (64, 256): aligned case.
    for N, C in [(37, 100), (64, 256)]:
        student = jax.random.normal(k1, (N, C), dtype=jnp.float32)
        teacher = jax.random.normal(k2, (N, C), dtype=jnp.float32)
        labels = jax.random.randint(k3, (N,), 0, C)

        # Faithful to the reference module (all-False other_mask => NaN).
        loss = dkd_loss(student, teacher, labels, temp=4.0, alpha=1.0, beta=6.0)
        jax.block_until_ready(loss)
        assert bool(jnp.isnan(loss))

        # Finite fast path, checked against a pure-JAX reference.
        loss_fast = dkd_loss(student, teacher, labels, temp=4.0, alpha=1.0,
                             beta=6.0, match_reference_nan=False)
        jax.block_until_ready(loss_fast)
        ref = _dkd_reference_finite(student, teacher, labels, 4.0, 1.0, 6.0)
        assert bool(jnp.isfinite(loss_fast))
        assert bool(jnp.allclose(loss_fast, ref, rtol=2e-3, atol=1e-5)), (loss_fast, ref)

    print("KERNEL_OK")
</pallas_src>

<mosaic_0001>
module attributes {stable_mosaic.version = 11 : i64} {
  func.func @_dkd_kernel(%arg0: i32, %arg1: memref<24x100xf32, #tpu.memory_space<vmem>>, %arg2: memref<24x100xf32, #tpu.memory_space<vmem>>, %arg3: memref<24x1xi32, #tpu.memory_space<vmem>>, %arg4: memref<1x100xi32, #tpu.memory_space<vmem>>, %arg5: memref<1x8x128xf32, #tpu.memory_space<vmem>>) attributes {dimension_semantics = [#tpu.dimension_semantics<parallel>], iteration_bounds = array<i64: 2>, scalar_prefetch = 0 : i64, scratch_operands = 0 : i64, tpu.core_type = #tpu.core_type<tc>, window_params = [{transform_indices = @transform_0, window_bounds = array<i64: 24, 100>}, {transform_indices = @transform_1, window_bounds = array<i64: 24, 100>}, {transform_indices = @transform_2, window_bounds = array<i64: 24, 1>}, {pipeline_mode = #tpu.pipeline_mode<synchronous>, transform_indices = @transform_3, window_bounds = array<i64: 1, 100>}, {transform_indices = @transform_4, window_bounds = array<i64: 1, 8, 128>}]} {
    %c0 = arith.constant 0 : index
    %c0_0 = arith.constant 0 : index
    %0 = vector.load %arg1[%c0, %c0_0] : memref<24x100xf32, #tpu.memory_space<vmem>>, vector<24x100xf32>
    %cst = arith.constant 2.500000e-01 : f32
    %1 = vector.broadcast %cst : f32 to vector<24x100xf32>
    %2 = arith.mulf %0, %1 : vector<24x100xf32>
    %c0_1 = arith.constant 0 : index
    %c0_2 = arith.constant 0 : index
    %3 = vector.load %arg2[%c0_1, %c0_2] : memref<24x100xf32, #tpu.memory_space<vmem>>, vector<24x100xf32>
    %cst_3 = arith.constant 2.500000e-01 : f32
    %4 = vector.broadcast %cst_3 : f32 to vector<24x100xf32>
    %5 = arith.mulf %3, %4 : vector<24x100xf32>
    %c0_4 = arith.constant 0 : index
    %c0_5 = arith.constant 0 : index
    %6 = vector.load %arg4[%c0_4, %c0_5] : memref<1x100xi32, #tpu.memory_space<vmem>>, vector<1x100xi32>
    %c0_6 = arith.constant 0 : index
    %c0_7 = arith.constant 0 : index
    %7 = vector.load %arg3[%c0_6, %c0_7] : memref<24x1xi32, #tpu.memory_space<vmem>>, vector<24x1xi32>
    %8 = vector.broadcast %6 : vector<1x100xi32> to vector<24x100xi32>
    %9 = vector.broadcast %7 : vector<24x1xi32> to vector<24x100xi32>
    %10 = arith.cmpi eq, %8, %9 : vector<24x100xi32>
    %cst_8 = arith.constant dense<0xFF800000> : vector<24xf32>
    %11 = vector.multi_reduction <maximumf>, %2, %cst_8 [1] : vector<24x100xf32> to vector<24xf32>
    %12 = vector.shape_cast %11 : vector<24xf32> to vector<24x1xf32>
    %cst_9 = arith.constant dense<0xFF800000> : vector<24xf32>
    %13 = vector.multi_reduction <maximumf>, %5, %cst_9 [1] : vector<24x100xf32> to vector<24xf32>
    %14 = vector.shape_cast %13 : vector<24xf32> to vector<24x1xf32>
    %15 = vector.broadcast %12 : vector<24x1xf32> to vector<24x100xf32>
    %16 = arith.subf %2, %15 : vector<24x100xf32>
    %17 = math.exp %16 : vector<24x100xf32>
    %18 = vector.broadcast %14 : vector<24x1xf32> to vector<24x100xf32>
    %19 = arith.subf %5, %18 : vector<24x100xf32>
    %20 = math.exp %19 : vector<24x100xf32>
    %cst_10 = arith.constant dense<0.000000e+00> : vector<24xf32>
    %21 = vector.multi_reduction <add>, %17, %cst_10 [1] : vector<24x100xf32> to vector<24xf32>
    %22 = vector.shape_cast %21 : vector<24xf32> to vector<24x1xf32>
    %cst_11 = arith.constant dense<0.000000e+00> : vector<24xf32>
    %23 = vector.multi_reduction <add>, %20, %cst_11 [1] : vector<24x100xf32> to vector<24xf32>
    %24 = vector.shape_cast %23 : vector<24xf32> to vector<24x1xf32>
    %cst_12 = arith.constant 0.000000e+00 : f32
    %25 = vector.broadcast %cst_12 : f32 to vector<24x100xf32>
    %26 = arith.select %10, %2, %25 : vector<24x100xi1>, vector<24x100xf32>
    %cst_13 = arith.constant dense<0.000000e+00> : vector<24xf32>
    %27 = vector.multi_reduction <add>, %26, %cst_13 [1] : vector<24x100xf32> to vector<24xf32>
    %28 = vector.shape_cast %27 : vector<24xf32> to vector<24x1xf32>
    %cst_14 = arith.constant 0.000000e+00 : f32
    %29 = vector.broadcast %cst_14 : f32 to vector<24x100xf32>
    %30 = arith.select %10, %5, %29 : vector<24x100xi1>, vector<24x100xf32>
    %cst_15 = arith.constant dense<0.000000e+00> : vector<24xf32>
    %31 = vector.multi_reduction <add>, %30, %cst_15 [1] : vector<24x100xf32> to vector<24xf32>
    %32 = vector.shape_cast %31 : vector<24xf32> to vector<24x1xf32>
    %33 = arith.subf %28, %12 : vector<24x1xf32>
    %34 = math.exp %33 : vector<24x1xf32>
    %35 = arith.subf %32, %14 : vector<24x1xf32>
    %36 = math.exp %35 : vector<24x1xf32>
    %37 = math.log %22 : vector<24x1xf32>
    %38 = math.log %24 : vector<24x1xf32>
    %39 = arith.divf %36, %24 : vector<24x1xf32>
    %40 = arith.subf %32, %14 : vector<24x1xf32>
    %41 = arith.subf %40, %38 : vector<24x1xf32>
    %42 = arith.subf %28, %12 : vector<24x1xf32>
    %43 = arith.subf %42, %37 : vector<24x1xf32>
    %44 = arith.subf %41, %43 : vector<24x1xf32>
    %45 = arith.mulf %39, %44 : vector<24x1xf32>
    %46 = arith.subf %22, %34 : vector<24x1xf32>
    %cst_16 = arith.constant 1.000000e-30 : f32
    %47 = vector.broadcast %cst_16 : f32 to vector<24x1xf32>
    %48 = arith.maximumf %46, %47 : vector<24x1xf32>
    %49 = arith.subf %24, %36 : vector<24x1xf32>
    %cst_17 = arith.constant 1.000000e-30 : f32
    %50 = vector.broadcast %cst_17 : f32 to vector<24x1xf32>
    %51 = arith.maximumf %49, %50 : vector<24x1xf32>
    %52 = arith.subf %5, %2 : vector<24x100xf32>
    %53 = arith.mulf %20, %52 : vector<24x100xf32>
    %cst_18 = arith.constant dense<0.000000e+00> : vector<24xf32>
    %54 = vector.multi_reduction <add>, %53, %cst_18 [1] : vector<24x100xf32> to vector<24xf32>
    %55 = vector.shape_cast %54 : vector<24xf32> to vector<24x1xf32>
    %56 = arith.subf %14, %12 : vector<24x1xf32>
    %57 = math.log %51 : vector<24x1xf32>
    %58 = math.log %48 : vector<24x1xf32>
    %59 = arith.subf %57, %58 : vector<24x1xf32>
    %60 = arith.addf %56, %59 : vector<24x1xf32>
    %61 = arith.subf %32, %28 : vector<24x1xf32>
    %62 = arith.mulf %36, %61 : vector<24x1xf32>
    %63 = arith.subf %55, %62 : vector<24x1xf32>
    %64 = arith.divf %63, %51 : vector<24x1xf32>
    %65 = arith.subf %64, %60 : vector<24x1xf32>
    %cst_19 = arith.constant 1.000000e+00 : f32
    %66 = vector.broadcast %cst_19 : f32 to vector<24x1xf32>
    %67 = arith.mulf %66, %45 : vector<24x1xf32>
    %cst_20 = arith.constant 6.000000e+00 : f32
    %68 = vector.broadcast %cst_20 : f32 to vector<24x1xf32>
    %69 = arith.mulf %68, %65 : vector<24x1xf32>
    %70 = arith.addf %67, %69 : vector<24x1xf32>
    %c24_i32 = arith.constant 24 : i32
    %71 = arith.muli %arg0, %c24_i32 : i32
    %72 = tpu.iota {dimensions = array<i32: 0>} : vector<24x1xi32>
    %73 = vector.broadcast %71 : i32 to vector<24x1xi32>
    %74 = arith.addi %73, %72 : vector<24x1xi32>
    %c37_i32 = arith.constant 37 : i32
    %75 = vector.broadcast %c37_i32 : i32 to vector<24x1xi32>
    %76 = arith.cmpi slt, %74, %75 : vector<24x1xi32>
    %cst_21 = arith.constant 0.000000e+00 : f32
    %77 = vector.broadcast %cst_21 : f32 to vector<24x1xf32>
    %78 = arith.select %76, %70, %77 : vector<24x1xi1>, vector<24x1xf32>
    %79 = vector.shape_cast %78 : vector<24x1xf32> to vector<1x24x1xf32>
    %cst_22 = arith.constant dense<0.000000e+00> : vector<1xf32>
    %80 = vector.multi_reduction <add>, %79, %cst_22 [1, 2] : vector<1x24x1xf32> to vector<1xf32>
    %81 = vector.shape_cast %80 : vector<1xf32> to vector<1x1x1xf32>
    %82 = vector.extract %81[0, 0, 0] : f32 from vector<1x1x1xf32>
    %83 = vector.broadcast %82 : f32 to vector<1x8x128xf32>
    %c0_23 = arith.constant 0 : index
    %c0_24 = arith.constant 0 : index
    %c0_25 = arith.constant 0 : index
    %84 = vector.load %arg5[%c0_23, %c0_24, %c0_25] : memref<1x8x128xf32, #tpu.memory_space<vmem>>, vector<1x8x128xf32>
    tpu.vector_store %arg5[%c0_23, %c0_24, %c0_25], %83 {strides = array<i32>} : memref<1x8x128xf32, #tpu.memory_space<vmem>>, vector<1x8x128xf32>,
    return
  }
  func.func @transform_0(%arg0: i32) -> (i32, i32) {
    %c0_i32 = arith.constant 0 : i32
    %c0_i32_0 = arith.constant 0 : i32
    return %arg0, %c0_i32 : i32, i32
  }
  func.func @transform_1(%arg0: i32) -> (i32, i32) {
    %c0_i32 = arith.constant 0 : i32
    %c0_i32_0 = arith.constant 0 : i32
    return %arg0, %c0_i32 : i32, i32
  }
  func.func @transform_2(%arg0: i32) -> (i32, i32) {
    %c0_i32 = arith.constant 0 : i32
    %c0_i32_0 = arith.constant 0 : i32
    return %arg0, %c0_i32 : i32, i32
  }
  func.func @transform_3(%arg0: i32) -> (i32, i32) {
    %c0_i32 = arith.constant 0 : i32
    %c0_i32_0 = arith.constant 0 : i32
    %c0_i32_1 = arith.constant 0 : i32
    return %c0_i32, %c0_i32_0 : i32, i32
  }
  func.func @transform_4(%arg0: i32) -> (i32, i32, i32) {
    %c0_i32 = arith.constant 0 : i32
    %c0_i32_0 = arith.constant 0 : i32
    %c0_i32_1 = arith.constant 0 : i32
    return %arg0, %c0_i32, %c0_i32_0 : i32, i32, i32
  }
}

</mosaic_0001>

<bundles_post_ra>
// kernel: tpu_custom_call.1
= control target key start
LH: loop header
LB: loop body
LE: loop exit
PB: predicated region body
PF: predicated region fallthrough
CT: control target
= control target key end

     0   :  { %9 = vsyncpa [#allocation3], 0  ;;  %s1563_s0 = inlined_call_operand.vmem [shape: f32[37,100], index: 0, kind: input, shape index: {}]   ;;  %s1564_s1 = inlined_call_operand.hbm [shape: f32[37,100], index: 1, kind: input, shape index: {}]   ;;  %s1565_s2 = inlined_call_operand.vmem [shape: s32[37,1], index: 2, kind: input, shape index: {}]   ;;  %s1566_s3 = inlined_call_operand.vmem [shape: s32[1,100], index: 3, kind: input, shape index: {}]   ;;  %s1567_s4 = inlined_call_operand.hbm [shape: f32[2,8,128], index: 4, kind: output, shape index: {}]  }
   0x1   :  { %11 = vsyncpa [#allocation3 + $0x1], 0 }
   0x2   :  { %12 = vsyncpa [#allocation4], 0 }
   0x3   :  { %14 = vsyncpa [#allocation4 + $0x1], 0  ;;  %s1025_s15 = smov 0   ;;  %s1027_s16 = smov 0  }
   0x4   :  { %s1029_s17 = smov 0   ;;  %s1031_s18 = smov 0  }
   0x5 LB: > { %s1046_s19 = sadd.s32 4294967295, %s994_s18   ;;  %s762_s20 = sadd.s32 4294967294, %s994_s18   ;;  %s994_s18 = sphi %s1031_s18, %s1602_s18   ;;  %s990_s17 = sphi %s1029_s17, %s1601_s17   ;;  %s986_s16 = sphi %s1027_s16, %s1600_s16   ;;  %s982_s15 = sphi %s1025_s15, %s1599_s15  }
   0x6   : > { %s1050_s21 = sadd.s32 1, %s994_s18   ;;  %s53_s22 = sadd.s32 1, %s990_s17 }
   0x7   : > { %s50_s23 = ssub.s32 %s994_s18, %s1050_s21  ;;  %p60_p0 = scmp.ne.s32.totalorder %s990_s17, %s986_s16 }
   0x8   : > { %p51_p1 = scmp.eq.s32.totalorder %s50_s23, 0  ;;  %p61_p2 = scmp.eq.s32.totalorder %s994_s18, 0 }
   0x9   : > { %p66_p3 = scmp.ne.s32.totalorder %s986_s16, %s982_s15  ;;  %p67_p4 = scmp.eq.s32.totalorder %s1046_s19, 0 }
   0xa   : > { %s1062_s24 = scalar_select %p51_p1, %s990_s17, %s53_s22  }
   0xb   : > { %p62_p5 = por %p61_p2, %p60_p0  ;;  %p1064_p6 = por %p67_p4, %p66_p3 }
   0xc   : > { %p137_p7 = scmp.eq.s32.totalorder %s1046_s19, 1  ;;  %p143_p8 = scmp.eq.s32.totalorder %s762_s20, 1 }
   0xd   : > { %p1568_p11 = scmp.ge.s32.totalorder %s994_s18, 2 }
   0xe   : > { %p1069_p9 = por %p137_p7, %p60_p0  ;;  %p1073_p10 = por %p143_p8, %p66_p3 }
   0xf   : > { %162 = sbr.rel (%p1568_p11) target bundleno = 58 (0x3a), region = 20 }
  0x14   : > { %182 = sbr.rel (!%p62_p5) target bundleno = 58 (0x3a), region = 28  ;;  %s183_s28 = sand.u32 (%p62_p5), 1, %s990_s17  }
  0x15   : > { %s188_s29 = smul.u32 (%p62_p5), 3, %s994_s18  ;;  %s1085_s9 = scalar_lea.sflag (%p62_p5), [#allocation3], %s183_s28 }
  0x16   : > { %s779_s30 = smul.u32 (%p62_p5), 24, %s183_s28 }
  0x17   : > { %s189_s5 = ssub.s32 (%p62_p5), 5, %s188_s29 }
  0x18   : > { %p190_p12 = scmp.lt.s32.totalorder (%p62_p5), %s189_s5, 3  ;;  %s187_s10 = scalar_lea.vmem (%p62_p5), [#allocation2], %s779_s30 }
  0x1a   : > { %s1604_s5 = smov (!%p190_p12, %s189_s5), 3 }
  0x1b   : > { %s765_s6 = sshll.u32 %s1604_s5, 3 }
  0x1c   : > { %s193_s7 = ssub.s32 24, %s765_s6 }
  0x1d   : > { %s194_s8 = sshll.u32 %s193_s7, 4 }
  0x1e   : > { %195 = vsyncadd %s1085_s9, %s194_s8  ;;  %p1088_p13 = scmp.ne.s32.totalorder %s765_s6, 0  ;;  %s778_s12 = smul.u32 24, %s994_s18 }
  0x1f   : > { %s1093_s13 = sshll.u32 %s187_s10, 4  ;;  %s769_s14 = sshll.u32 %s1604_s5, 7  ;;  %s203_s13 = int_to_ptr.vmem [resolvable:$true] %s1093_s13 }
  0x20   : > { %s198_s23 = scalar_lea.hbm %s1564_s1, %s778_s12  ;;  %s891_s30 = sshrl.u32 %s769_s14, 4 }
  0x21   : > { %s200_s28 = sshll.u32 %s198_s23, 4  ;;  %s900_s10 = scalar_lea.hbm %s1564_s1, 40  ;;  %s1100_s28 = int_to_ptr.hbm [resolvable:$true] %s200_s28 }
  0x22   : > { %s889_s29 = sshra.s32 %s1100_s28, 4  ;;  %s890_s29 = int_to_ptr.hbm [resolvable:$true] %s889_s29 }
  0x23   : > { %s896_s6 = scalar_lea.hbm %s890_s29, %s891_s30  ;;  %p901_p3 = scmp.lt.s32.totalorder %s890_s29, %s1564_s1 }
  0x24   : > { %p897_p0 = scmp.ne.s32.totalorder %s890_s29, %s896_s6  ;;  %p902_p4 = scmp.lt.s32.totalorder %s900_s10, %s896_s6 }
  0x26   : > { %p898_p1 = pnand %p897_p0, %p1088_p13  ;;  %p903_p5 = por %p902_p4, %p901_p3 }
  0x28   : > { %p899_p2 = pneg %p898_p1 }
  0x2a   : > { %p904_p7 = pnand %p903_p5, %p899_p2 }
  0x2c   : > { %907 = shalt.err (!%p904_p7)
}
  0x2d   : > { %s908_s22 = sshra.s32 %s203_s13, 4  ;;  %s996_s7 = smov [#allocation2]   ;;  %s909_s22 = int_to_ptr.vmem [resolvable:$true] %s908_s22 }
  0x2e   : > { %s915_s23 = scalar_lea.vmem %s909_s22, %s891_s30  ;;  %s919_s8 = scalar_lea.vmem %s996_s7, 48 }
  0x2f   : > { %p916_p8 = scmp.ne.s32.totalorder %s909_s22, %s915_s23  ;;  %p921_p1 = scmp.lt.s32.totalorder %s919_s8, %s915_s23 }
  0x31   : > { %p917_p12 = pnand %p916_p8, %p1088_p13 }
  0x33   : > { %p918_p0 = pneg %p917_p12 }
  0x35   : > { %p923_p11 = pnand %p921_p1, %p918_p0 }
  0x37   : > { %926 = shalt.err (!%p923_p11)
}
  0x38   : > { %s997_s29 = smov 128   ;;  %s998_s6 = smov 8  }
  0x39   : > { %208 = dma.hbm_to_vmem [thread:$0]  (%p1088_p13), %s1100_s28, %s769_s14, %s203_s13, %s1085_s9, %s997_s29, %s997_s29, %s998_s6  }
  0x3a PF: > { %p770_p2 = scmp.ge.s32.totalorder %s994_s18, 1  ;;  %p227_p3 = scmp.lt.s32.totalorder %s994_s18, 3 }
  0x3c   : > { %p228_p4 = pnand %p770_p2, %p227_p3 }
  0x3d   : > { %s1128_s30 = sand.u32 (!%p228_p4), 1, %s986_s16  }
  0x3e   : > { %231 = sbr.rel (%p228_p4) target bundleno = 581 (0x245), region = 36  ;;  %s234_s20 = scalar_lea.sflag (!%p228_p4), [#allocation3], %s1128_s30 }
  0x3f   : > { %s780_s10 = smul.u32 (!%p228_p4), 24, %s1128_s30 }
  0x41   : > { %s1132_s11 = scalar_lea.vmem (!%p228_p4), [#allocation2], %s780_s10 }
  0x43   : > { %973 = dma.done.wait (%p1064_p6), %s234_s20, 384  }
  0x44   : > { %975 = vsyncadd (%p1064_p6), %s234_s20, 4294966912  ;;  %s281_s5 = smul.u32 3, %s1046_s19  ;;  %v999_v0 = vmov 0   ;;  %v320_v1 = vld [vmem:[%s1132_s11] sm:$0xff]  ;;  %vm343_vm0 = vcmask 818176   ;;  %v321_v5 = vld [vmem:[%s1132_s11 + $0x8] sm:$0xff] }
  0x45   : > { %827 = vset.pattern.permute.xlu2 %v999_v0  ;;  %826 = vset.pattern.permute.xlu0 %v999_v0  ;;  %v1143_v3 = vmul.f32 0.25, %v320_v1  ;;  %v1148_v7 = vmul.f32 0.25, %v321_v5  ;;  %v322_v16 = vld [vmem:[%s1132_s11 + $0x10] sm:$0xff]  ;;  %v828_v22 = vld [vmem:[%s1566_s3] ss:$0 sm:$0xff]  ;;  %s620_s8 = smul.u32 24, %s1046_s19 }
  0x46   : > { %p286_p11 = scmp.lt.s32.totalorder %s281_s5, 4  ;;  %v1164_v17 = vmul.f32 0.25, %v322_v16  ;;  %s771_s29 = sshll.u32 %s1128_s30, 3 }
  0x47   : > { %v353_v6 = vsel %vm343_vm0, %v1143_v3, -inf  ;;  %v356_v9 = vsel %vm343_vm0, %v1148_v7, -inf  ;;  %s775_s6 = sshll.u32 %s1046_s19, 3  ;;  %s948_s23 = scalar_lea.hbm %s1567_s4, 16 }
  0x48   : > { %s1606_s5 = smov (!%p286_p11, %s281_s5), 4  ;;  %354 = vmax.xlane.f32.xlu1 %v353_v6  ;;  %v359_v18 = vsel %vm343_vm0, %v1164_v17, -inf  ;;  %s663_s11 = scalar_lea.hbm %s1567_s4, %s775_s6 }
  0x49   : > { %s772_s9 = sshll.u32 %s1606_s5, 3  ;;  %s280_s5 = scalar_lea.vmem [#allocation5], %s771_s29 }
  0x4a   : > { %s308_s28 = scalar_lea.vmem %s1565_s2, %s772_s9  ;;  %s289_s22 = scalar_lea.vmem %s1563_s0, %s772_s9 }
  0x4b   : > { %v329_v2 = vld [vmem:[%s308_s28 + $0x10] sm:$0xff]  ;;  %v327_v4 = vld [vmem:[%s308_s28] sm:$0xff]  ;;  %v328_v8 = vld [vmem:[%s308_s28 + $0x8] sm:$0xff]  ;;  %s665_s9 = sshll.u32 %s280_s5, 4  ;;  %s667_s13 = sshll.u32 %s663_s11, 4  ;;  %s666_s9 = int_to_ptr.vmem [resolvable:$true] %s665_s9  ;;  %s668_s13 = int_to_ptr.hbm [resolvable:$true] %s667_s13 }
  0x4c   : > { %338 = vperm.xlu2 %827, %v329_v2   ;;  %332 = vperm.xlu0 %826, %v327_v4   ;;  %v315_v10 = vld [vmem:[%s289_s22 + $0x8] sm:$0xff]  ;;  %v316_v13 = vld [vmem:[%s289_s22 + $0x10] sm:$0xff]  ;;  %v314_v19 = vld [vmem:[%s289_s22] sm:$0xff]  ;;  %s653_s28 = scalar_lea.sflag [#allocation4], %s1128_s30  ;;  %s942_s25 = sshra.s32 %s668_s13, 4  ;;  %s943_s25 = int_to_ptr.hbm [resolvable:$true] %s942_s25 }
  0x4d   : > { %v1155_v11 = vmul.f32 0.25, %v315_v10  ;;  %v1159_v14 = vmul.f32 0.25, %v316_v13  ;;  %v1168_v20 = vmul.f32 0.25, %v314_v19  ;;  %s944_s12 = scalar_lea.hbm %s943_s25, 8  ;;  %p949_p7 = scmp.lt.s32.totalorder %s943_s25, %s1567_s4 }
  0x4e   : > { %p945_p6 = scmp.ne.s32.totalorder %s943_s25, %s944_s12  ;;  %p950_p8 = scmp.lt.s32.totalorder %s948_s23, %s944_s12 }
  0x4f   : > { %v347_v12 = vsel %vm343_vm0, %v1155_v11, -inf  ;;  %v350_v15 = vsel %vm343_vm0, %v1159_v14, -inf  ;;  %v344_v21 = vsel %vm343_vm0, %v1168_v20, -inf  ;;  %v522_v55 = vsub.f32 %v1148_v7, %v1155_v11 }
  0x50   : > { %357 = vmax.xlane.f32.xlu1 %v356_v9  ;;  %v523_v6 = vsub.f32 %v1164_v17, %v1159_v14  ;;  %v521_v9 = vsub.f32 %v1143_v3, %v1168_v20  ;;  %p946_p13 = pnand %p945_p6, %p1069_p9  ;;  %p951_p12 = por %p950_p8, %p949_p7 }
  0x52   : > { %p947_p5 = pneg %p946_p13 }
  0x54   : > { %335 = vperm.xlu0 %826, %v328_v8   ;;  %p952_p0 = pnand %p951_p12, %p947_p5 }
  0x58   : > { %348 = vmax.xlane.f32.xlu1 %v347_v12 }
  0x60   : > { %351 = vmax.xlane.f32.xlu1 %v350_v15 }
  0x75   : > { %360 = vmax.xlane.f32.xlu2 %v359_v18 }
  0x7e   : > { %345 = vmax.xlane.f32.xlu0 %v344_v21 }
  0xa6   : > { %v339_v24 = vpop.permute.xlu2 %338 }
  0xa7   : > { %vm342_vm2 = vcmp.eq.s32.totalorder %v828_v22, %v339_v24 }
  0xa8   : > { %v400_v33 = vsel %vm342_vm2, %v1159_v14, 0.0  ;;  %v412_v40 = vsel %vm342_vm2, %v1164_v17, 0.0 }
  0xa9   : > { %v407_v36 = vsel %vm343_vm0, %v400_v33, 0.0  ;;  %v419_v42 = vsel %vm343_vm0, %v412_v40, 0.0 }
  0xbb   : > { %v1175_v25 = vpop.xlane.xlu1 %354 }
  0xbc   : > { %v371_v28 = vsub.f32 %v1143_v3, %v1175_v25 }
  0xbe   : > { %v333_v23 = vpop.permute.xlu0 %332  ;;  %v374_v31 = vmul.f32 1.442695, %v371_v28 }
  0xbf   : > { %vm340_vm1 = vcmp.eq.s32.totalorder %v828_v22, %v333_v23 }
  0xc0   : > { %v410_v26 = vsel %vm340_vm1, %v1143_v3, 0.0  ;;  %v398_v27 = vsel %vm340_vm1, %v1168_v20, 0.0  ;;  %829 = vpow2.f32 %v374_v31 }
  0xc1   : > { %v413_v29 = vsel %vm343_vm0, %v410_v26, 0.0  ;;  %v401_v30 = vsel %vm343_vm0, %v398_v27, 0.0 }
  0xc2   : > { %414 = vadd.xlane.f32.xlu1 %v413_v29  ;;  %402 = vadd.xlane.f32.xlu2 %v401_v30 }
  0xc3   : > { %v1188_v37 = vpop.xlane.xlu1 %357 }
  0xc4   : > { %v372_v41 = vsub.f32 %v1148_v7, %v1188_v37 }
  0xc6   : > { %v336_v32 = vpop.permute.xlu0 %335  ;;  %v830_v38 = vpop.eup %829  ;;  %v376_v43 = vmul.f32 1.442695, %v372_v41 }
  0xc7   : > { %vm341_vm3 = vcmp.eq.s32.totalorder %v828_v22, %v336_v32  ;;  %v389_v39 = vsel %vm343_vm0, %v830_v38, 0.0 }
  0xc8   : > { %v411_v34 = vsel %vm341_vm3, %v1148_v7, 0.0  ;;  %390 = vadd.xlane.f32.xlu0 %v389_v39  ;;  %831 = vpow2.f32 %v376_v43  ;;  %v399_v45 = vsel %vm341_vm3, %v1155_v11, 0.0 }
  0xc9   : > { %v416_v35 = vsel %vm343_vm0, %v411_v34, 0.0  ;;  %v404_v47 = vsel %vm343_vm0, %v399_v45, 0.0 }
  0xca   : > { %417 = vadd.xlane.f32.xlu1 %v416_v35  ;;  %408 = vadd.xlane.f32.xlu2 %v407_v36 }
  0xcb   : > { %v1195_v44 = vpop.xlane.xlu1 %348 }
  0xcc   : > { %v363_v46 = vsub.f32 %v1155_v11, %v1195_v44  ;;  %v524_v11 = vmul.f32 %v830_v38, %v521_v9 }
  0xce   : > { %v367_v48 = vmul.f32 1.442695, %v363_v46  ;;  %v832_v49 = vpop.eup %831  ;;  %v527_v13 = vsel %vm343_vm0, %v524_v11, 0.0  ;;  %v537_v46 = vsub.f32 %v1188_v37, %v1195_v44 }
  0xcf   : > { %v392_v50 = vsel %vm343_vm0, %v832_v49, 0.0  ;;  %v525_v59 = vmul.f32 %v832_v49, %v522_v55 }
  0xd0   : > { %833 = vpow2.f32 %v367_v48 }
  0xd1   : > { %v530_v61 = vsel %vm343_vm0, %v525_v59, 0.0 }
  0xd2   : > { %420 = vadd.xlane.f32.xlu1 %v419_v42 }
  0xd3   : > { %v1206_v54 = vpop.xlane.xlu1 %351 }
  0xd4   : > { %v364_v57 = vsub.f32 %v1159_v14, %v1206_v54 }
  0xd6   : > { %v834_v51 = vpop.eup %833  ;;  %v369_v60 = vmul.f32 1.442695, %v364_v57 }
  0xd7   : > { %v383_v53 = vsel %vm343_vm0, %v834_v51, 0.0 }
  0xda   : > { %405 = vadd.xlane.f32.xlu1 %v404_v47 }
  0xe2   : > { %393 = vadd.xlane.f32.xlu1 %v392_v50 }
  0xe8   : > { %v1203_v52 = vpop.xlane.xlu2 %360 }
  0xe9   : > { %v373_v56 = vsub.f32 %v1164_v17, %v1203_v52 }
  0xea   : > { %384 = vadd.xlane.f32.xlu1 %v383_v53 }
  0xeb   : > { %v378_v58 = vmul.f32 1.442695, %v373_v56 }
  0xed   : > { %835 = vpow2.f32 %v378_v58 }
  0xee   : > { %837 = vpow2.f32 %v369_v60 }
  0xf1   : > { %v1215_v62 = vpop.xlane.xlu0 %345 }
  0xf2   : > { %v362_v0 = vsub.f32 %v1168_v20, %v1215_v62  ;;  %531 = vadd.xlane.f32.xlu1 %v530_v61 }
  0xf3   : > { %v836_v63 = vpop.eup %835 }
  0xf4   : > { %v395_v1 = vsel %vm343_vm0, %v836_v63, 0.0  ;;  %v365_v2 = vmul.f32 1.442695, %v362_v0  ;;  %v838_v4 = vpop.eup %837  ;;  %v526_v10 = vmul.f32 %v836_v63, %v523_v6 }
  0xf5   : > { %396 = vadd.xlane.f32.xlu2 %v395_v1  ;;  %v386_v5 = vsel %vm343_vm0, %v838_v4, 0.0 }
  0xf6   : > { %839 = vpow2.f32 %v365_v2  ;;  %v533_v12 = vsel %vm343_vm0, %v526_v10, 0.0  ;;  %v621_v10 = vlaneseq }
  0xfc   : > { %v840_v7 = vpop.eup %839 }
  0xfd   : > { %387 = vadd.xlane.f32.xlu2 %v386_v5  ;;  %v380_v8 = vsel %vm343_vm0, %v840_v7, 0.0 }
  0xfe   : > { %381 = vadd.xlane.f32.xlu0 %v380_v8 }
 0x105   : > { %534 = vadd.xlane.f32.xlu2 %v533_v12 }
 0x106   : > { %528 = vadd.xlane.f32.xlu0 %v527_v13 }
 0x135   : > { %v415_v15 = vpop.xlane.xlu1 %414  ;;  %v403_v23 = vpop.xlane.xlu2 %402 }
 0x136   : > { %v1229_v16 = vsub.f32 %v415_v15, %v1175_v25  ;;  %v1268_v33 = vsub.f32 %v403_v23, %v1215_v62  ;;  %v557_v58 = vsub.f32 %v415_v15, %v403_v23 }
 0x138   : > { %v434_v14 = vmul.f32 1.442695, %v1229_v16  ;;  %v425_v40 = vmul.f32 1.442695, %v1268_v33 }
 0x13a   : > { %841 = vpow2.f32 %v434_v14 }
 0x13b   : > { %v1242_v20 = vpop.xlane.xlu0 %390 }
 0x13c   : > { %v463_v53 = vand.u32 2147483648, %v1242_v20  ;;  %vm457_vm4 = vweird.f32 %v1242_v20  ;;  %v461_v63 = vand.u32 2147483647, %v1242_v20 }
 0x13d   : > { %v1232_v17 = vpop.xlane.xlu1 %417  ;;  %v1270_v34 = vpop.xlane.xlu2 %408 }
 0x13e   : > { %v1240_v19 = vsub.f32 %v1232_v17, %v1188_v37  ;;  %v1283_v39 = vsub.f32 %v1270_v34, %v1206_v54  ;;  %v1315_v5 = vor.u32 1.1754944e-38, %v463_v53  ;;  %vm1449_vm2 = vcmp.eq.f32.partialorder %v461_v63, 8.507059e+37 }
 0x140   : > { %v1236_v3 = vpop.eup %841  ;;  %v436_v22 = vmul.f32 1.442695, %v1240_v19  ;;  %v429_v51 = vmul.f32 1.442695, %v1283_v39 }
 0x141   : > { %v515_v21 = vsub.f32 %v1242_v20, %v1236_v3  ;;  %v1313_v4 = vmul.f32 %v1236_v3, %v557_v58 }
 0x142   : > { %843 = vpow2.f32 %v436_v22 }
 0x143   : > { %v1249_v26 = vmax.f32 %v515_v21, 1e-30  ;;  %845 = vrcp.f32 %v1242_v20 }
 0x145   : > { %v1234_v18 = vpop.xlane.xlu1 %420  ;;  %847 = vrcp.f32 %v1249_v26  ;;  %v577_v0 = vand.u32 2147483648, %v1249_v26  ;;  %vm571_vm5 = vweird.f32 %v1249_v26  ;;  %v575_v12 = vand.u32 2147483647, %v1249_v26 }
 0x146   : > { %v1278_v38 = vsub.f32 %v1234_v18, %v1203_v52  ;;  %v559_v11 = vsub.f32 %v1234_v18, %v1270_v34 }
 0x147   : > { %v1326_v13 = vor.u32 1.1754944e-38, %v577_v0 }
 0x148   : > { %v1258_v29 = vpop.eup %843  ;;  %v438_v49 = vmul.f32 1.442695, %v1278_v38 }
 0x149   : > { %v1265_v32 = vpop.eup %845 }
 0x14a   : > { %v453_v41 = vmul.f32 %v1265_v32, %v1242_v20  ;;  %vm458_vm6 = vweird.f32 %v1265_v32 }
 0x14b   : > { %v1272_v35 = vpop.eup %847  ;;  %vm1359_vm10 = vmor %vm457_vm4, %vm458_vm6  ;;  %vm1467_vm6 = vcmp.eq.f32.partialorder %v575_v12, 8.507059e+37 }
 0x14c   : > { %v567_v42 = vmul.f32 %v1272_v35, %v1249_v26  ;;  %v454_v59 = vsub.f32 1.0, %v453_v41  ;;  %vm572_vm7 = vweird.f32 %v1272_v35 }
 0x14d   : > { %v1247_v24 = vpop.xlane.xlu1 %405  ;;  %vm1380_vm11 = vmor %vm571_vm5, %vm572_vm7 }
 0x14e   : > { %v1253_v27 = vsub.f32 %v1247_v24, %v1195_v44  ;;  %v568_v60 = vsub.f32 1.0, %v567_v42  ;;  %v455_v8 = vmul.f32 %v1265_v32, %v454_v59  ;;  %v558_v22 = vsub.f32 %v1232_v17, %v1247_v24 }
 0x14f   : > { %v1348_v17 = vshrl.u32 %v621_v10, 7  ;;  %v1597_v59 = vsub.f32 %v1175_v25, %v1215_v62 }
 0x150   : > { %v427_v28 = vmul.f32 1.442695, %v1253_v27  ;;  %v569_v9 = vmul.f32 %v1272_v35, %v568_v60  ;;  %v1343_v34 = vadd.f32 %v1265_v32, %v455_v8 }
 0x151   : > { %v1401_v8 = vadd.s32 8, %v1348_v17 }
 0x155   : > { %v1260_v30 = vpop.xlane.xlu1 %393 }
 0x156   : > { %849 = vrcp.f32 %v1260_v30  ;;  %v516_v31 = vsub.f32 %v1260_v30, %v1258_v29  ;;  %vm472_vm8 = vweird.f32 %v1260_v30 }
 0x157   : > { %851 = vpow2.f32 %v427_v28 }
 0x158   : > { %v1274_v36 = vmax.f32 %v516_v31, 1e-30  ;;  %853 = vlog2.f32 %v1242_v20 }
 0x15a   : > { %855 = vrcp.f32 %v1274_v36  ;;  %vm586_vm15 = vweird.f32 %v1274_v36 }
 0x15b   : > { %857 = vpow2.f32 %v425_v40  ;;  %v1346_v40 = vadd.f32 %v1272_v35, %v569_v9 }
 0x15c   : > { %v1291_v43 = vpop.eup %849  ;;  %859 = vlog2.f32 %v1249_v26 }
 0x15d   : > { %v852_v45 = vpop.eup %851  ;;  %v385_v50 = vpop.xlane.xlu1 %384  ;;  %v468_v55 = vmul.f32 %v1291_v43, %v1260_v30  ;;  %861 = vpow2.f32 %v438_v49  ;;  %vm473_vm9 = vweird.f32 %v1291_v43  ;;  %v478_v49 = vand.u32 2147483648, %v1260_v30 }
 0x15e   : > { %v510_v56 = vsub.f32 %v385_v50, %v852_v45  ;;  %v854_v57 = vpop.eup %853  ;;  %863 = vpow2.f32 %v429_v51  ;;  %vm1388_vm12 = vmor %vm472_vm8, %vm473_vm9 }
 0x15f   : > { %v469_v6 = vsub.f32 1.0, %v468_v55  ;;  %v1317_v7 = vmul.f32 0.6931472, %v854_v57  ;;  %865 = vlog2.f32 %v1260_v30  ;;  %v590_v57 = vand.u32 2147483647, %v1274_v36 }
 0x160   : > { %v1304_v61 = vpop.eup %855  ;;  %v513_v1 = vmax.f32 %v510_v56, 1e-30  ;;  %v1371_v56 = vmul.f32 %v1258_v29, %v558_v22 }
 0x161   : > { %v582_v2 = vmul.f32 %v1304_v61, %v1274_v36  ;;  %v1328_v15 = vpop.eup %857  ;;  %v470_v18 = vmul.f32 %v1291_v43, %v469_v6  ;;  %vm587_vm14 = vweird.f32 %v1304_v61  ;;  %vm1422_vm0 = vcmp.eq.f32.partialorder %v590_v57, 8.507059e+37 }
 0x162   : > { %867 = vlog2.f32 %v513_v1  ;;  %v860_v21 = vpop.eup %859  ;;  %v592_v1 = vand.u32 2147483648, %v1274_v36  ;;  %vm1430_vm1 = vmor %vm586_vm15, %vm587_vm14  ;;  %vm635_vm15 = vcmask 7168  }
 0x163   : > { %v583_v14 = vsub.f32 1.0, %v582_v2  ;;  %869 = vlog2.f32 %v385_v50  ;;  %v1337_v28 = vpop.eup %861  ;;  %v476_v50 = vand.u32 2147483647, %v1260_v30  ;;  %v1367_v53 = vmul.f32 0.6931472, %v860_v21 }
 0x164   : > { %871 = vlog2.f32 %v1274_v36  ;;  %v864_v24 = vpop.eup %863  ;;  %v471_v55 = vadd.f32 %v1291_v43, %v470_v18  ;;  %v1394_v2 = vmul.f32 %v1337_v28, %v559_v11  ;;  %v479_v21 = vor.u32 1.1754944e-38, %v478_v49 }
 0x165   : > { %v866_v45 = vpop.eup %865  ;;  %v584_v51 = vmul.f32 %v1304_v61, %v583_v14  ;;  %v1408_v14 = vstv %s620_s8  ;;  %vm1410_vm13 = vcmp.eq.f32.partialorder %v476_v50, 8.507059e+37  ;;  %v593_v50 = vor.u32 1.1754944e-38, %v592_v1  ;;  %v532_v36 = vpop.xlane.xlu1 %531 }
 0x166   : > { %v449_v10 = vmul.f32 0.6931472, %v866_v45  ;;  %v475_v48 = vsel %vm1388_vm12, %v1291_v43, %v471_v55  ;;  %v627_v42 = vadd.s32 %v1408_v14, %v1401_v8 }
 0x167   : > { %v585_v18 = vadd.f32 %v1304_v61, %v584_v51  ;;  %v1436_v55 = vsel %vm1410_vm13, %v479_v21, %v475_v48 }
 0x168   : > { %v1340_v31 = vpop.xlane.xlu2 %396  ;;  %v868_v60 = vpop.eup %867 }
 0x169   : > { %873 = vrcp.f32 %v1340_v31  ;;  %v517_v41 = vsub.f32 %v1340_v31, %v1337_v28  ;;  %v870_v9 = vpop.eup %869  ;;  %v548_v45 = vmul.f32 0.6931472, %v868_v60  ;;  %v498_v60 = vsub.f32 %v1240_v19, %v449_v10 }
 0x16a   : > { %v872_v11 = vpop.eup %871  ;;  %v443_v49 = vmul.f32 0.6931472, %v870_v9  ;;  %v589_v57 = vsel %vm1430_vm1, %v1304_v61, %v585_v18  ;;  %vm487_vm4 = vweird.f32 %v1340_v31 }
 0x16b   : > { %v1374_v58 = vmax.f32 %v517_v41, 1e-30  ;;  %v542_v47 = vmul.f32 0.6931472, %v872_v11 }
 0x16d   : > { %875 = vrcp.f32 %v1374_v58  ;;  %v552_v10 = vsub.f32 %v542_v47, %v548_v45  ;;  %v594_v47 = vsel %vm1422_vm0, %v593_v50, %v589_v57  ;;  %v493_v45 = vand.u32 2147483648, %v1340_v31 }
 0x16e   : > { %877 = vlog2.f32 %v1340_v31  ;;  %v605_v23 = vand.u32 2147483647, %v1374_v58  ;;  %vm601_vm9 = vweird.f32 %v1374_v58 }
 0x16f   : > { %v1416_v41 = vpop.eup %873  ;;  %v555_v63 = vadd.f32 %v552_v10, %v537_v46 }
 0x170   : > { %v483_v51 = vmul.f32 %v1416_v41, %v1340_v31  ;;  %v388_v30 = vpop.xlane.xlu2 %387  ;;  %vm488_vm3 = vweird.f32 %v1416_v41  ;;  %vm606_vm13 = vcmp.eq.f32.partialorder %v605_v23, 8.507059e+37 }
 0x171   : > { %879 = vlog2.f32 %v388_v30  ;;  %v511_v43 = vsub.f32 %v388_v30, %v864_v24  ;;  %v382_v19 = vpop.xlane.xlu0 %381  ;;  %v501_v24 = vsub.f32 %v1253_v27, %v443_v49  ;;  %v564_v30 = vsub.f32 %v532_v36, %v1371_v56  ;;  %vm1473_vm7 = vmor %vm487_vm4, %vm488_vm3 }
 0x172   : > { %v484_v1 = vsub.f32 1.0, %v483_v51  ;;  %881 = vlog2.f32 %v1374_v58  ;;  %v509_v6 = vsub.f32 %v382_v19, %v1328_v15  ;;  %v491_v15 = vand.u32 2147483647, %v1340_v31 }
 0x173   : > { %v876_v9 = vpop.eup %875  ;;  %v514_v11 = vmax.f32 %v511_v43, 1e-30  ;;  %883 = vlog2.f32 %v382_v19  ;;  %v504_v37 = vsub.f32 %v498_v60, %v501_v24  ;;  %v595_v44 = vmul.f32 %v594_v47, %v564_v30 }
 0x174   : > { %v485_v48 = vmul.f32 %v1416_v41, %v484_v1  ;;  %v597_v21 = vmul.f32 %v876_v9, %v1374_v58  ;;  %v512_v22 = vmax.f32 %v509_v6, 1e-30  ;;  %v878_v27 = vpop.eup %877  ;;  %v607_v6 = vand.u32 2147483648, %v1374_v58 }
 0x175   : > { %885 = vlog2.f32 %v514_v11  ;;  %vm602_vm5 = vweird.f32 %v876_v9  ;;  %v451_v46 = vmul.f32 0.6931472, %v878_v27  ;;  %vm1477_vm8 = vcmp.eq.f32.partialorder %v491_v15, 8.507059e+37 }
 0x176   : > { %v598_v18 = vsub.f32 1.0, %v597_v21  ;;  %v486_v56 = vadd.f32 %v1416_v41, %v485_v48  ;;  %887 = vlog2.f32 %v512_v22  ;;  %v612_v19 = vsub.f32 %v595_v44, %v555_v63  ;;  %vm603_vm12 = vmor %vm601_vm9, %vm602_vm5 }
 0x177   : > { %v880_v20 = vpop.eup %879  ;;  %v608_v10 = vor.u32 1.1754944e-38, %v607_v6  ;;  %v494_v24 = vor.u32 1.1754944e-38, %v493_v45  ;;  %v499_v58 = vsub.f32 %v1278_v38, %v451_v46  ;;  %v1593_v38 = vsel %vm1359_vm10, %v1265_v32, %v1343_v34 }
 0x178   : > { %v882_v49 = vpop.eup %881  ;;  %v445_v50 = vmul.f32 0.6931472, %v880_v20  ;;  %v599_v51 = vmul.f32 %v876_v9, %v598_v18  ;;  %v535_v12 = vpop.xlane.xlu2 %534  ;;  %v490_v60 = vsel %vm1473_vm7, %v1416_v41, %v486_v56  ;;  %v615_v63 = vmul.f32 6.0, %v612_v19 }
 0x179   : > { %v884_v36 = vpop.eup %883  ;;  %v529_v11 = vpop.xlane.xlu0 %528  ;;  %v544_v30 = vmul.f32 0.6931472, %v882_v49  ;;  %v565_v27 = vsub.f32 %v535_v12, %v1394_v2  ;;  %v495_v41 = vsel %vm1477_vm8, %v494_v24, %v490_v60  ;;  %v465_v2 = vsel %vm1449_vm2, %v1315_v5, %v1593_v38 }
 0x17a   : > { %v441_v57 = vmul.f32 0.6931472, %v884_v36  ;;  %v600_v26 = vadd.f32 %v876_v9, %v599_v51  ;;  %v502_v48 = vsub.f32 %v1283_v39, %v445_v50  ;;  %v563_v45 = vsub.f32 %v529_v11, %v1313_v4 }
 0x17b   : > { %v886_v1 = vpop.eup %885  ;;  %v481_v39 = vmul.f32 %v1258_v29, %v1436_v55  ;;  %v1594_v4 = vsub.f32 %v1203_v52, %v1206_v54  ;;  %v1595_v32 = vsel %vm1380_vm11, %v1272_v35, %v1346_v40  ;;  %v496_v34 = vmul.f32 %v1337_v28, %v495_v41 }
 0x17c   : > { %v550_v21 = vmul.f32 0.6931472, %v886_v1  ;;  %v604_v47 = vsel %vm603_vm12, %v876_v9, %v600_v26  ;;  %v888_v22 = vpop.eup %887  ;;  %v500_v56 = vsub.f32 %v1268_v33, %v441_v57  ;;  %v624_v9 = vadd.s32 16, %v1348_v17 }
 0x17d   : > { %v609_v15 = vsel %vm606_vm13, %v608_v10, %v604_v47  ;;  %v546_v20 = vmul.f32 0.6931472, %v888_v22  ;;  %v505_v23 = vsub.f32 %v499_v58, %v502_v48  ;;  %v507_v55 = vmul.f32 %v504_v37, %v481_v39 }
 0x17e   : > { %v553_v18 = vsub.f32 %v544_v30, %v550_v21  ;;  %v610_v29 = vmul.f32 %v609_v15, %v565_v27  ;;  %v579_v5 = vsel %vm1467_vm6, %v1326_v13, %v1595_v32  ;;  %v1596_v52 = vsub.f32 %v1229_v16, %v1317_v7 }
 0x17f   : > { %v551_v33 = vsub.f32 %v1367_v53, %v546_v20  ;;  %v580_v49 = vmul.f32 %v579_v5, %v563_v45  ;;  %v466_v35 = vmul.f32 %v1236_v3, %v465_v2  ;;  %v626_v13 = vadd.s32 %v1408_v14, %v1348_v17 }
 0x180   : > { %v556_v6 = vadd.f32 %v553_v18, %v1594_v4  ;;  %v503_v54 = vsub.f32 %v1596_v52, %v500_v56  ;;  %v628_v28 = vadd.s32 %v1408_v14, %v624_v9  ;;  %v618_v40 = vadd.f32 %v615_v63, %v507_v55 }
 0x181   : > { %v554_v61 = vadd.f32 %v551_v33, %v1597_v59  ;;  %v508_v51 = vmul.f32 %v505_v23, %v496_v34  ;;  %vm630_vm10 = vcmp.lt.s32.totalorder %v627_v42, 37  ;;  %vm629_vm11 = vcmp.lt.s32.totalorder %v626_v13, 37 }
 0x182   : > { %v613_v53 = vsub.f32 %v610_v29, %v556_v6  ;;  %v506_v16 = vmul.f32 %v503_v54, %v466_v35  ;;  %vm631_vm14 = vcmp.lt.s32.totalorder %v628_v28, 37  ;;  %v633_v62 = vsel %vm630_vm10, %v618_v40, 0.0 }
 0x183   : > { %v611_v8 = vsub.f32 %v580_v49, %v554_v61  ;;  %v637_v37 = vsel %vm635_vm15, %v633_v62, 0.0 }
 0x184   : > { %v616_v50 = vmul.f32 6.0, %v613_v53 }
 0x185   : > { %v614_v7 = vmul.f32 6.0, %v611_v8 }
 0x186   : > { %v619_v0 = vadd.f32 %v616_v50, %v508_v51 }
 0x187   : > { %v617_v25 = vadd.f32 %v614_v7, %v506_v16 }
 0x188   : > { %v634_v3 = vsel %vm631_vm14, %v619_v0, 0.0 }
 0x189   : > { %v632_v36 = vsel %vm629_vm11, %v617_v25, 0.0  ;;  %v639_v44 = vsel %vm635_vm15, %v634_v3, 0.0 }
 0x18a   : > { %v636_v17 = vsel %vm635_vm15, %v632_v36, 0.0 }
 0x18b   : > { %v638_v14 = vadd.f32 %v637_v37, %v636_v17 }
 0x18d   : > { %v640_v46 = vadd.f32 %v639_v44, %v638_v14 }
 0x18f   : > { %641 = vadd.xlane.f32.xlu0 %v640_v46 }
 0x202   : > { %v642_v43 = vpop.xlane.xlu0 %641 }
 0x203   : > { %v643_v31 = vrot.slane %v642_v43, 4 }
 0x205   : > { %v644_v57 = vadd.f32 %v643_v31, %v642_v43 }
 0x207   : > { %v645_v26 = vrot.slane %v644_v57, 2 }
 0x209   : > { %v646_v12 = vadd.f32 %v645_v26, %v644_v57 }
 0x20b   : > { %v647_v60 = vrot.slane %v646_v12, 1 }
 0x20d   : > { %v648_v1 = vadd.f32 %v647_v60, %v646_v12 }
 0x20f   : > { %781 = vpush %v648_v1 }
 0x240   : > { %s782_s14 = spop %781 }
 0x241   : > { %v650_v19 = vstv %s782_s14 }
 0x242   : > { %651 = vst [vmem:[%s280_s5] sm:$0xff] %v650_v19 }
 0x243   : > { %955 = shalt.err (!%p952_p0)
}
 0x244   : > { %784 = dma.vmem_to_hbm [thread:$0]  (%p1069_p9), %s666_s9, 128, %s668_s13, %s653_s28  }
 0x245 PF: > { %s679_s30 = sand.u32 1, %s982_s15   ;;  %p1598_p1 = scmp.ge.s32.totalorder %s994_s18, 2 }
 0x246   : > { %s680_s29 = scalar_lea.sflag [#allocation4], %s679_s30 }
 0x247   : > { %p787_p2 = pnand %p1598_p1, %p1073_p10 }
 0x249   : > { %p788_p3 = pneg %p787_p2 }
 0x24b   : > { %977 = dma.done.wait (%p788_p3), %s680_s29, 128  }
 0x24c   : > { %979 = vsyncadd (%p788_p3), %s680_s29, 4294967168  ;;  %p17_p4 = scmp.ge.s32.totalorder %s1050_s21, 4   ;;  %s1599_s15 = smov %s986_s16 }
 0x24d   : > { %s1600_s16 = smov %s990_s17  ;;  %s1601_s17 = smov %s1062_s24 }
 0x24e   : > { %s1602_s18 = smov %s1050_s21  ;;  %19 = sbr.rel (!%p17_p4) target bundleno = 5 (0x5), region = 87 }
 0x253   :  { %686 = vsyncpa [#allocation3], 1 }
 0x254   :  { %688 = vsyncpa [#allocation3 + $0x1], 1 }
 0x255   :  { %689 = vsyncpa [#allocation4], 1 }
 0x256   :  { %691 = vsyncpa [#allocation4 + $0x1], 1 }

</bundles_post_ra>
